<compile_context>
chip_gen: v7x
topology: tpu7x:2x2x1
jax: 0.10.0
libtpu: 0.0.40
codegen_flags: <defaults>
</compile_context>

<pallas_src>
import jax
import jax.numpy as jnp
from jax.experimental import pallas as pl
from jax.experimental.pallas import tpu as pltpu

N_IN = 28 ** 2          # 784
N_H = 4
W1_ROWS = 8             # w1^T zero-padded to one full sublane group for the MXU

# Flat SMEM layout of the small parameters.
_B1 = 0                             # b1[k]           -> _B1 + k
_W2 = _B1 + N_H                     # w2[k, j] (in,out)-> _W2 + k*N_H + j
_B2 = _W2 + N_H * N_H               # b2[j]           -> _B2 + j
_W3 = _B2 + N_H                     # w3[k, 0]        -> _W3 + k
_B3 = _W3 + N_H                     # b3
_P_LEN = 32


def _sigmoid(z):
    # exp and the approximate reciprocal both run on the EUP slot (free next
    # to the VPU MACs); plenty accurate for a sigmoid chain.
    return pl.reciprocal(1.0 + jnp.exp(-z), approx=True)


def mlp_kernel(x_ref, w1t_ref, p_ref, o_ref):
    """x_ref: (tile_b, 784) f32 VMEM; w1t_ref: (8, 784) bf16 VMEM (rows 4..7 zero);
    p_ref: (32,) f32 SMEM; o_ref: (1, tile_b) f32 VMEM."""
    # Layer 1 (784 -> 4) on the MXU. x streams as f32 from HBM and is cast to
    # bf16 in VMEM; contracting BOTH operands on their feature axis (A @ B^T)
    # yields the result already transposed / lane-dense: (8, tile_b).
    xb = x_ref[...].astype(jnp.bfloat16)
    h1 = jax.lax.dot_general(
        w1t_ref[...], xb,
        dimension_numbers=(((1,), (1,)), ((), ())),   # w1^T @ x^T
        preferred_element_type=jnp.float32,
    )

    # From here on every value is a (1, tile_b) fully lane-dense row.
    r = [_sigmoid(h1[k:k + 1, :] + p_ref[_B1 + k]) for k in range(N_H)]

    # Layer 2 (4 -> 4): unrolled scalar multiply-adds on the VPU (an N=4
    # matmul would waste the MXU on a dependent chain).
    h2 = []
    for j in range(N_H):
        z = r[0] * p_ref[_W2 + j]
        for k in range(1, N_H):
            z = z + r[k] * p_ref[_W2 + k * N_H + j]
        h2.append(_sigmoid(z + p_ref[_B2 + j]))

    # Output layer (4 -> 1): unrolled scalar multiply-adds.
    z = h2[0] * p_ref[_W3 + 0]
    for k in range(1, N_H):
        z = z + h2[k] * p_ref[_W3 + k]
    out = _sigmoid(z + p_ref[_B3])

    o_ref[...] = out.astype(o_ref.dtype)   # unmasked full-lane (1, tile_b) store


def _round_up(n, m):
    return ((int(n) + m - 1) // m) * m


def pack_small_params(b1, w2, b2, w3, b3):
    """Pack the sub-KB parameters into one flat f32[32] buffer (lands in SMEM)."""
    flat = jnp.concatenate([
        jnp.reshape(b1, (N_H,)),
        jnp.reshape(w2, (N_H * N_H,)),     # stored (in, out), row-major
        jnp.reshape(b2, (N_H,)),
        jnp.reshape(w3, (N_H,)),           # w3[:, 0]
        jnp.reshape(b3, (1,)),
    ]).astype(jnp.float32)
    return jnp.pad(flat, (0, _P_LEN - flat.shape[0]))


def _pick_tile(B, tile_b):
    """Batch tile: <=4096 (v7x 64 MiB VMEM budget), multiple of 128 whenever the
    grid has >1 step (lane-dense output blocks), and >=2 steps for medium
    batches so both v7x TensorCores get work."""
    tile_b = _round_up(max(128, min(int(tile_b), 4096)), 128)
    b8 = _round_up(B, 8)
    if b8 <= 512:
        return b8                                         # tiny batch: one step
    if b8 <= tile_b:
        return min(_round_up(-(-B // 2), 128), tile_b)    # split into >=2 steps
    return tile_b


def neural_net_forward(x, w1, b1, w2, b2, w3, b3, *, tile_b=4096):
    """Forward pass of NeuralNet. x: (B, 784) f32. Weights stored transposed vs
    PyTorch: w1 (784,4), w2 (4,4), w3 (4,1); biases b1 (1,4), b2 (1,4), b3 (1,1).
    Returns (B, 1) f32."""
    B = int(x.shape[0])

    tile_b = _pick_tile(B, tile_b)
    num_tiles = -(-B // tile_b)            # cdiv; ragged last tile is handled by Pallas
    total = num_tiles * tile_b

    # Only tiny batches are padded (a few KiB copy); large batches never get a
    # wrapper-side full-array pad.
    if num_tiles == 1 and tile_b > B:
        x = jnp.pad(x, ((0, tile_b - B), (0, 0)))

    # w1^T, zero-padded to 8 rows for the MXU, bf16 (sub-KB; cast cost negligible).
    w1t = jnp.pad(jnp.transpose(w1.astype(jnp.bfloat16)),
                  ((0, W1_ROWS - N_H), (0, 0)))
    packed = pack_small_params(b1, w2, b2, w3, b3)

    cost = pl.CostEstimate(
        flops=2 * B * N_IN * N_H + 2 * B * N_H * (N_H + 1),
        transcendentals=2 * B * (2 * N_H + 1),
        bytes_accessed=B * N_IN * 4 + B * 4,
    )

    out = pl.pallas_call(
        mlp_kernel,
        out_shape=jax.ShapeDtypeStruct((1, total), jnp.float32),
        grid=(num_tiles,),
        in_specs=[
            pl.BlockSpec((tile_b, N_IN), lambda i: (i, 0)),      # x: streamed f32, double-buffered
            pl.BlockSpec((W1_ROWS, N_IN), lambda i: (0, 0)),     # w1^T: VMEM-resident
            pl.BlockSpec(memory_space=pltpu.MemorySpace.SMEM),   # packed scalar params
        ],
        out_specs=pl.BlockSpec((1, tile_b), lambda i: (0, i)),   # lane-dense output block
        compiler_params=pltpu.CompilerParams(
            dimension_semantics=("parallel",),
            vmem_limit_bytes=48 * 1024 * 1024,
        ),
        cost_estimate=cost,
    )(x, w1t, packed)

    return out.reshape(-1)[:B].reshape(B, 1)


def init_params(key):
    """Deterministic init matching PyTorch Linear shapes (stored transposed):
       layer1: (784,4), layer2: (4,4), output: (4,1)."""
    k1, k2, k3, k4, k5, k6 = jax.random.split(key, 6)

    def uinit(k, shape, fan_in):
        bound = 1.0 / jnp.sqrt(fan_in)
        return jax.random.uniform(k, shape, jnp.float32, -bound, bound)

    w1 = uinit(k1, (N_IN, N_H), 784.0)
    b1 = uinit(k2, (1, N_H), 784.0)
    w2 = uinit(k3, (N_H, N_H), 4.0)
    b2 = uinit(k4, (1, N_H), 4.0)
    w3 = uinit(k5, (N_H, 1), 4.0)
    b3 = uinit(k6, (1, 1), 4.0)
    return w1, b1, w2, b2, w3, b3


if __name__ == "__main__":
    key = jax.random.PRNGKey(0)
    kx1, kx2, kp = jax.random.split(key, 3)

    params = init_params(kp)
    w1, b1, w2, b2, w3, b3 = params

    def ref_forward(x):
        h1 = jax.nn.sigmoid(x @ w1 + b1)
        h2 = jax.nn.sigmoid(h1 @ w2 + b2)
        return jax.nn.sigmoid(h2 @ w3 + b3)

    # 1) small batch: single grid step, tile clamped to the batch.
    x_small = jax.random.normal(kx1, (8, N_IN), jnp.float32)
    out_small = jax.block_until_ready(neural_net_forward(x_small, *params))
    assert out_small.shape == (8, 1)
    assert jnp.allclose(out_small, ref_forward(x_small), atol=2e-2), "small-batch mismatch"

    # 2) larger, non-multiple batch: 4-step grid with a ragged last tile
    #    (no wrapper-side pad or cast of x).
    x_big = jax.random.normal(kx2, (1000, N_IN), jnp.float32)
    out_big = jax.block_until_ready(neural_net_forward(x_big, *params, tile_b=256))
    assert out_big.shape == (1000, 1)
    assert jnp.allclose(out_big, ref_forward(x_big), atol=2e-2), "large-batch mismatch"

    print("KERNEL_OK")
</pallas_src>

<mosaic_0001>
module attributes {stable_mosaic.version = 11 : i64} {
  func.func @mlp_kernel(%arg0: i32, %arg1: memref<8x784xf32, #tpu.memory_space<vmem>>, %arg2: memref<8x784xbf16, #tpu.memory_space<vmem>>, %arg3: memref<32xf32, #tpu.memory_space<smem>>, %arg4: memref<1x8xf32, #tpu.memory_space<vmem>>) attributes {dimension_semantics = [#tpu.dimension_semantics<parallel>], iteration_bounds = array<i64: 1>, scalar_prefetch = 0 : i64, scratch_operands = 0 : i64, tpu.core_type = #tpu.core_type<tc>, window_params = [{transform_indices = @transform_0, window_bounds = array<i64: 8, 784>}, {pipeline_mode = #tpu.pipeline_mode<synchronous>, transform_indices = @transform_1, window_bounds = array<i64: 8, 784>}, {transform_indices = @transform_2, window_bounds = array<i64: 32>}, {transform_indices = @transform_3, window_bounds = array<i64: 1, 8>}]} {
    %c0 = arith.constant 0 : index
    %c0_0 = arith.constant 0 : index
    %0 = vector.load %arg1[%c0, %c0_0] : memref<8x784xf32, #tpu.memory_space<vmem>>, vector<8x784xf32>
    %1 = arith.truncf %0 : vector<8x784xf32> to vector<8x784xbf16>
    %c0_1 = arith.constant 0 : index
    %c0_2 = arith.constant 0 : index
    %2 = vector.load %arg2[%c0_1, %c0_2] : memref<8x784xbf16, #tpu.memory_space<vmem>>, vector<8x784xbf16>
    %cst = arith.constant dense<0.000000e+00> : vector<8x8xf32>
    %3 = tpu.matmul %2, %1, %cst {dimension_numbers = #tpu.dot_dimension_numbers<[1], [1], [0], [0], [0, 0, 1, 0], [], []>} : vector<8x784xbf16>, vector<8x784xbf16>, vector<8x8xf32> -> vector<8x8xf32>
    %4 = vector.extract_strided_slice %3 {offsets = [0, 0], sizes = [1, 8], strides = [1, 1]} : vector<8x8xf32> to vector<1x8xf32>
    %c0_3 = arith.constant 0 : index
    %5 = memref.load %arg3[%c0_3] : memref<32xf32, #tpu.memory_space<smem>>
    %6 = vector.broadcast %5 : f32 to vector<1x8xf32>
    %7 = arith.addf %4, %6 : vector<1x8xf32>
    %cst_4 = arith.constant 0.000000e+00 : f32
    %8 = vector.broadcast %cst_4 : f32 to vector<1x8xf32>
    %9 = arith.subf %8, %7 : vector<1x8xf32>
    %10 = math.exp %9 : vector<1x8xf32>
    %cst_5 = arith.constant 1.000000e+00 : f32
    %11 = vector.broadcast %cst_5 : f32 to vector<1x8xf32>
    %12 = arith.addf %11, %10 : vector<1x8xf32>
    %13 = tpu.reciprocal %12 {approx = true} : vector<1x8xf32> -> vector<1x8xf32>
    %14 = vector.extract_strided_slice %3 {offsets = [1, 0], sizes = [1, 8], strides = [1, 1]} : vector<8x8xf32> to vector<1x8xf32>
    %c1 = arith.constant 1 : index
    %15 = memref.load %arg3[%c1] : memref<32xf32, #tpu.memory_space<smem>>
    %16 = vector.broadcast %15 : f32 to vector<1x8xf32>
    %17 = arith.addf %14, %16 : vector<1x8xf32>
    %cst_6 = arith.constant 0.000000e+00 : f32
    %18 = vector.broadcast %cst_6 : f32 to vector<1x8xf32>
    %19 = arith.subf %18, %17 : vector<1x8xf32>
    %20 = math.exp %19 : vector<1x8xf32>
    %cst_7 = arith.constant 1.000000e+00 : f32
    %21 = vector.broadcast %cst_7 : f32 to vector<1x8xf32>
    %22 = arith.addf %21, %20 : vector<1x8xf32>
    %23 = tpu.reciprocal %22 {approx = true} : vector<1x8xf32> -> vector<1x8xf32>
    %24 = vector.extract_strided_slice %3 {offsets = [2, 0], sizes = [1, 8], strides = [1, 1]} : vector<8x8xf32> to vector<1x8xf32>
    %c2 = arith.constant 2 : index
    %25 = memref.load %arg3[%c2] : memref<32xf32, #tpu.memory_space<smem>>
    %26 = vector.broadcast %25 : f32 to vector<1x8xf32>
    %27 = arith.addf %24, %26 : vector<1x8xf32>
    %cst_8 = arith.constant 0.000000e+00 : f32
    %28 = vector.broadcast %cst_8 : f32 to vector<1x8xf32>
    %29 = arith.subf %28, %27 : vector<1x8xf32>
    %30 = math.exp %29 : vector<1x8xf32>
    %cst_9 = arith.constant 1.000000e+00 : f32
    %31 = vector.broadcast %cst_9 : f32 to vector<1x8xf32>
    %32 = arith.addf %31, %30 : vector<1x8xf32>
    %33 = tpu.reciprocal %32 {approx = true} : vector<1x8xf32> -> vector<1x8xf32>
    %34 = vector.extract_strided_slice %3 {offsets = [3, 0], sizes = [1, 8], strides = [1, 1]} : vector<8x8xf32> to vector<1x8xf32>
    %c3 = arith.constant 3 : index
    %35 = memref.load %arg3[%c3] : memref<32xf32, #tpu.memory_space<smem>>
    %36 = vector.broadcast %35 : f32 to vector<1x8xf32>
    %37 = arith.addf %34, %36 : vector<1x8xf32>
    %cst_10 = arith.constant 0.000000e+00 : f32
    %38 = vector.broadcast %cst_10 : f32 to vector<1x8xf32>
    %39 = arith.subf %38, %37 : vector<1x8xf32>
    %40 = math.exp %39 : vector<1x8xf32>
    %cst_11 = arith.constant 1.000000e+00 : f32
    %41 = vector.broadcast %cst_11 : f32 to vector<1x8xf32>
    %42 = arith.addf %41, %40 : vector<1x8xf32>
    %43 = tpu.reciprocal %42 {approx = true} : vector<1x8xf32> -> vector<1x8xf32>
    %c4 = arith.constant 4 : index
    %44 = memref.load %arg3[%c4] : memref<32xf32, #tpu.memory_space<smem>>
    %45 = vector.broadcast %44 : f32 to vector<1x8xf32>
    %46 = arith.mulf %13, %45 : vector<1x8xf32>
    %c8 = arith.constant 8 : index
    %47 = memref.load %arg3[%c8] : memref<32xf32, #tpu.memory_space<smem>>
    %48 = vector.broadcast %47 : f32 to vector<1x8xf32>
    %49 = arith.mulf %23, %48 : vector<1x8xf32>
    %50 = arith.addf %46, %49 : vector<1x8xf32>
    %c12 = arith.constant 12 : index
    %51 = memref.load %arg3[%c12] : memref<32xf32, #tpu.memory_space<smem>>
    %52 = vector.broadcast %51 : f32 to vector<1x8xf32>
    %53 = arith.mulf %33, %52 : vector<1x8xf32>
    %54 = arith.addf %50, %53 : vector<1x8xf32>
    %c16 = arith.constant 16 : index
    %55 = memref.load %arg3[%c16] : memref<32xf32, #tpu.memory_space<smem>>
    %56 = vector.broadcast %55 : f32 to vector<1x8xf32>
    %57 = arith.mulf %43, %56 : vector<1x8xf32>
    %58 = arith.addf %54, %57 : vector<1x8xf32>
    %c20 = arith.constant 20 : index
    %59 = memref.load %arg3[%c20] : memref<32xf32, #tpu.memory_space<smem>>
    %60 = vector.broadcast %59 : f32 to vector<1x8xf32>
    %61 = arith.addf %58, %60 : vector<1x8xf32>
    %cst_12 = arith.constant 0.000000e+00 : f32
    %62 = vector.broadcast %cst_12 : f32 to vector<1x8xf32>
    %63 = arith.subf %62, %61 : vector<1x8xf32>
    %64 = math.exp %63 : vector<1x8xf32>
    %cst_13 = arith.constant 1.000000e+00 : f32
    %65 = vector.broadcast %cst_13 : f32 to vector<1x8xf32>
    %66 = arith.addf %65, %64 : vector<1x8xf32>
    %67 = tpu.reciprocal %66 {approx = true} : vector<1x8xf32> -> vector<1x8xf32>
    %c5 = arith.constant 5 : index
    %68 = memref.load %arg3[%c5] : memref<32xf32, #tpu.memory_space<smem>>
    %69 = vector.broadcast %68 : f32 to vector<1x8xf32>
    %70 = arith.mulf %13, %69 : vector<1x8xf32>
    %c9 = arith.constant 9 : index
    %71 = memref.load %arg3[%c9] : memref<32xf32, #tpu.memory_space<smem>>
    %72 = vector.broadcast %71 : f32 to vector<1x8xf32>
    %73 = arith.mulf %23, %72 : vector<1x8xf32>
    %74 = arith.addf %70, %73 : vector<1x8xf32>
    %c13 = arith.constant 13 : index
    %75 = memref.load %arg3[%c13] : memref<32xf32, #tpu.memory_space<smem>>
    %76 = vector.broadcast %75 : f32 to vector<1x8xf32>
    %77 = arith.mulf %33, %76 : vector<1x8xf32>
    %78 = arith.addf %74, %77 : vector<1x8xf32>
    %c17 = arith.constant 17 : index
    %79 = memref.load %arg3[%c17] : memref<32xf32, #tpu.memory_space<smem>>
    %80 = vector.broadcast %79 : f32 to vector<1x8xf32>
    %81 = arith.mulf %43, %80 : vector<1x8xf32>
    %82 = arith.addf %78, %81 : vector<1x8xf32>
    %c21 = arith.constant 21 : index
    %83 = memref.load %arg3[%c21] : memref<32xf32, #tpu.memory_space<smem>>
    %84 = vector.broadcast %83 : f32 to vector<1x8xf32>
    %85 = arith.addf %82, %84 : vector<1x8xf32>
    %cst_14 = arith.constant 0.000000e+00 : f32
    %86 = vector.broadcast %cst_14 : f32 to vector<1x8xf32>
    %87 = arith.subf %86, %85 : vector<1x8xf32>
    %88 = math.exp %87 : vector<1x8xf32>
    %cst_15 = arith.constant 1.000000e+00 : f32
    %89 = vector.broadcast %cst_15 : f32 to vector<1x8xf32>
    %90 = arith.addf %89, %88 : vector<1x8xf32>
    %91 = tpu.reciprocal %90 {approx = true} : vector<1x8xf32> -> vector<1x8xf32>
    %c6 = arith.constant 6 : index
    %92 = memref.load %arg3[%c6] : memref<32xf32, #tpu.memory_space<smem>>
    %93 = vector.broadcast %92 : f32 to vector<1x8xf32>
    %94 = arith.mulf %13, %93 : vector<1x8xf32>
    %c10 = arith.constant 10 : index
    %95 = memref.load %arg3[%c10] : memref<32xf32, #tpu.memory_space<smem>>
    %96 = vector.broadcast %95 : f32 to vector<1x8xf32>
    %97 = arith.mulf %23, %96 : vector<1x8xf32>
    %98 = arith.addf %94, %97 : vector<1x8xf32>
    %c14 = arith.constant 14 : index
    %99 = memref.load %arg3[%c14] : memref<32xf32, #tpu.memory_space<smem>>
    %100 = vector.broadcast %99 : f32 to vector<1x8xf32>
    %101 = arith.mulf %33, %100 : vector<1x8xf32>
    %102 = arith.addf %98, %101 : vector<1x8xf32>
    %c18 = arith.constant 18 : index
    %103 = memref.load %arg3[%c18] : memref<32xf32, #tpu.memory_space<smem>>
    %104 = vector.broadcast %103 : f32 to vector<1x8xf32>
    %105 = arith.mulf %43, %104 : vector<1x8xf32>
    %106 = arith.addf %102, %105 : vector<1x8xf32>
    %c22 = arith.constant 22 : index
    %107 = memref.load %arg3[%c22] : memref<32xf32, #tpu.memory_space<smem>>
    %108 = vector.broadcast %107 : f32 to vector<1x8xf32>
    %109 = arith.addf %106, %108 : vector<1x8xf32>
    %cst_16 = arith.constant 0.000000e+00 : f32
    %110 = vector.broadcast %cst_16 : f32 to vector<1x8xf32>
    %111 = arith.subf %110, %109 : vector<1x8xf32>
    %112 = math.exp %111 : vector<1x8xf32>
    %cst_17 = arith.constant 1.000000e+00 : f32
    %113 = vector.broadcast %cst_17 : f32 to vector<1x8xf32>
    %114 = arith.addf %113, %112 : vector<1x8xf32>
    %115 = tpu.reciprocal %114 {approx = true} : vector<1x8xf32> -> vector<1x8xf32>
    %c7 = arith.constant 7 : index
    %116 = memref.load %arg3[%c7] : memref<32xf32, #tpu.memory_space<smem>>
    %117 = vector.broadcast %116 : f32 to vector<1x8xf32>
    %118 = arith.mulf %13, %117 : vector<1x8xf32>
    %c11 = arith.constant 11 : index
    %119 = memref.load %arg3[%c11] : memref<32xf32, #tpu.memory_space<smem>>
    %120 = vector.broadcast %119 : f32 to vector<1x8xf32>
    %121 = arith.mulf %23, %120 : vector<1x8xf32>
    %122 = arith.addf %118, %121 : vector<1x8xf32>
    %c15 = arith.constant 15 : index
    %123 = memref.load %arg3[%c15] : memref<32xf32, #tpu.memory_space<smem>>
    %124 = vector.broadcast %123 : f32 to vector<1x8xf32>
    %125 = arith.mulf %33, %124 : vector<1x8xf32>
    %126 = arith.addf %122, %125 : vector<1x8xf32>
    %c19 = arith.constant 19 : index
    %127 = memref.load %arg3[%c19] : memref<32xf32, #tpu.memory_space<smem>>
    %128 = vector.broadcast %127 : f32 to vector<1x8xf32>
    %129 = arith.mulf %43, %128 : vector<1x8xf32>
    %130 = arith.addf %126, %129 : vector<1x8xf32>
    %c23 = arith.constant 23 : index
    %131 = memref.load %arg3[%c23] : memref<32xf32, #tpu.memory_space<smem>>
    %132 = vector.broadcast %131 : f32 to vector<1x8xf32>
    %133 = arith.addf %130, %132 : vector<1x8xf32>
    %cst_18 = arith.constant 0.000000e+00 : f32
    %134 = vector.broadcast %cst_18 : f32 to vector<1x8xf32>
    %135 = arith.subf %134, %133 : vector<1x8xf32>
    %136 = math.exp %135 : vector<1x8xf32>
    %cst_19 = arith.constant 1.000000e+00 : f32
    %137 = vector.broadcast %cst_19 : f32 to vector<1x8xf32>
    %138 = arith.addf %137, %136 : vector<1x8xf32>
    %139 = tpu.reciprocal %138 {approx = true} : vector<1x8xf32> -> vector<1x8xf32>
    %c24 = arith.constant 24 : index
    %140 = memref.load %arg3[%c24] : memref<32xf32, #tpu.memory_space<smem>>
    %141 = vector.broadcast %140 : f32 to vector<1x8xf32>
    %142 = arith.mulf %67, %141 : vector<1x8xf32>
    %c25 = arith.constant 25 : index
    %143 = memref.load %arg3[%c25] : memref<32xf32, #tpu.memory_space<smem>>
    %144 = vector.broadcast %143 : f32 to vector<1x8xf32>
    %145 = arith.mulf %91, %144 : vector<1x8xf32>
    %146 = arith.addf %142, %145 : vector<1x8xf32>
    %c26 = arith.constant 26 : index
    %147 = memref.load %arg3[%c26] : memref<32xf32, #tpu.memory_space<smem>>
    %148 = vector.broadcast %147 : f32 to vector<1x8xf32>
    %149 = arith.mulf %115, %148 : vector<1x8xf32>
    %150 = arith.addf %146, %149 : vector<1x8xf32>
    %c27 = arith.constant 27 : index
    %151 = memref.load %arg3[%c27] : memref<32xf32, #tpu.memory_space<smem>>
    %152 = vector.broadcast %151 : f32 to vector<1x8xf32>
    %153 = arith.mulf %139, %152 : vector<1x8xf32>
    %154 = arith.addf %150, %153 : vector<1x8xf32>
    %c28 = arith.constant 28 : index
    %155 = memref.load %arg3[%c28] : memref<32xf32, #tpu.memory_space<smem>>
    %156 = vector.broadcast %155 : f32 to vector<1x8xf32>
    %157 = arith.addf %154, %156 : vector<1x8xf32>
    %cst_20 = arith.constant 0.000000e+00 : f32
    %158 = vector.broadcast %cst_20 : f32 to vector<1x8xf32>
    %159 = arith.subf %158, %157 : vector<1x8xf32>
    %160 = math.exp %159 : vector<1x8xf32>
    %cst_21 = arith.constant 1.000000e+00 : f32
    %161 = vector.broadcast %cst_21 : f32 to vector<1x8xf32>
    %162 = arith.addf %161, %160 : vector<1x8xf32>
    %163 = tpu.reciprocal %162 {approx = true} : vector<1x8xf32> -> vector<1x8xf32>
    %c0_22 = arith.constant 0 : index
    %c0_23 = arith.constant 0 : index
    %164 = vector.load %arg4[%c0_22, %c0_23] : memref<1x8xf32, #tpu.memory_space<vmem>>, vector<1x8xf32>
    tpu.vector_store %arg4[%c0_22, %c0_23], %163 {strides = array<i32>} : memref<1x8xf32, #tpu.memory_space<vmem>>, vector<1x8xf32>,
    return
  }
  func.func @transform_0(%arg0: i32) -> (i32, i32) {
    %c0_i32 = arith.constant 0 : i32
    %c0_i32_0 = arith.constant 0 : i32
    return %arg0, %c0_i32 : i32, i32
  }
  func.func @transform_1(%arg0: i32) -> (i32, i32) {
    %c0_i32 = arith.constant 0 : i32
    %c0_i32_0 = arith.constant 0 : i32
    %c0_i32_1 = arith.constant 0 : i32
    return %c0_i32, %c0_i32_0 : i32, i32
  }
  func.func @transform_2(%arg0: i32) -> i32 {
    %c0_i32 = arith.constant 0 : i32
    %c0_i32_0 = arith.constant 0 : i32
    return %c0_i32 : i32
  }
  func.func @transform_3(%arg0: i32) -> (i32, i32) {
    %c0_i32 = arith.constant 0 : i32
    %c0_i32_0 = arith.constant 0 : i32
    return %c0_i32, %arg0 : i32, i32
  }
}

</mosaic_0001>

<bundles_post_ra>
// kernel: tpu_custom_call.1
= control target key start
LH: loop header
LB: loop body
LE: loop exit
PB: predicated region body
PF: predicated region fallthrough
CT: control target
= control target key end

     0   :  { %8 = vsyncpa [#allocation3], 0  ;;  %s779_s0 = inlined_call_operand.hbm [shape: f32[8,784], index: 0, kind: input, shape index: {}]   ;;  %s780_s1 = inlined_call_operand.hbm [shape: bf16[8,784], index: 1, kind: input, shape index: {}]   ;;  %s781_s2 = inlined_call_operand.vmem [shape: f32[32], index: 2, kind: input, shape index: {}]   ;;  %s782_s3 = inlined_call_operand.hbm [shape: f32[1,8], index: 3, kind: output, shape index: {}]  }
   0x1   :  { %9 = vsyncpa [#allocation7], 0 }
   0x2   :  { %10 = vsyncpa [#allocation5], 0 }
   0x3   :  { %11 = vsyncpa [#allocation4], 0  ;;  %s652_s12 = smov [#allocation2]   ;;  %s653_s14 = smov [#allocation6]  }
   0x4   :  { %s18_s13 = sshll.u32 %s652_s12, 4  ;;  %s28_s15 = sshll.u32 %s653_s14, 4  ;;  %s19_s13 = int_to_ptr.vmem [resolvable:$true] %s18_s13  ;;  %s29_s15 = int_to_ptr.vmem [resolvable:$true] %s28_s15 }
   0x5   :  { %s566_s18 = scalar_lea.hbm %s779_s0, 896 }
   0x6   :  { %p567_p0 = scmp.ne.s32.totalorder %s779_s0, %s566_s18  ;;  %p570_p1 = scmp.lt.u32.totalorder %s566_s18, %s779_s0 }
   0x8   :  { %p572_p2 = pnand %p570_p1, %p567_p0 }
   0xa   :  { %575 = shalt.err (!%p572_p2)
}
   0xb   :  { %s576_s23 = scalar_lea.vmem %s19_s13, 896  ;;  %p581_p4 = scmp.lt.s32.totalorder %s19_s13, %s19_s13 }
   0xc   :  { %p577_p3 = scmp.ne.s32.totalorder %s19_s13, %s576_s23  ;;  %p582_p5 = scmp.lt.s32.totalorder %s576_s23, %s576_s23 }
   0xe   :  { %p583_p6 = por %p582_p5, %p581_p4 }
  0x10   :  { %p584_p7 = pnand %p583_p6, %p577_p3 }
  0x12   :  { %587 = shalt.err (!%p584_p7)
}
  0x13   :  { %21 = dma.hbm_to_vmem [thread:$0]  %s779_s0, 896, %s19_s13, [#allocation3]  }
  0x14   :  { %s588_s28 = scalar_lea.hbm %s780_s1, 448 }
  0x15   :  { %p589_p8 = scmp.ne.s32.totalorder %s780_s1, %s588_s28  ;;  %p592_p9 = scmp.lt.u32.totalorder %s588_s28, %s780_s1 }
  0x17   :  { %p594_p10 = pnand %p592_p9, %p589_p8 }
  0x19   :  { %597 = shalt.err (!%p594_p10)
}
  0x1a   :  { %s598_s6 = scalar_lea.vmem %s29_s15, 448  ;;  %p603_p12 = scmp.lt.s32.totalorder %s29_s15, %s29_s15 }
  0x1b   :  { %p599_p11 = scmp.ne.s32.totalorder %s29_s15, %s598_s6  ;;  %p604_p13 = scmp.lt.s32.totalorder %s598_s6, %s598_s6 }
  0x1d   :  { %p605_p0 = por %p604_p13, %p603_p12 }
  0x1f   :  { %p606_p1 = pnand %p605_p0, %p599_p11 }
  0x21   :  { %609 = shalt.err (!%p606_p1)
}
  0x22   :  { %31 = dma.hbm_to_vmem [thread:$0]  %s780_s1, 448, %s29_s15, [#allocation7]  }
  0x23   :  { %s38_s10 = sshll.u32 %s781_s2, 4  ;;  %s39_s10 = int_to_ptr.vmem [resolvable:$true] %s38_s10 }
  0x24   :  { %s610_s11 = scalar_lea.vmem %s39_s10, 16  ;;  %p615_p3 = scmp.lt.s32.totalorder %s39_s10, %s39_s10 }
  0x25   :  { %p611_p2 = scmp.ne.s32.totalorder %s39_s10, %s610_s11  ;;  %p616_p4 = scmp.lt.s32.totalorder %s610_s11, %s610_s11 }
  0x27   :  { %p617_p5 = por %p616_p4, %p615_p3 }
  0x29   :  { %p618_p6 = pnand %p617_p5, %p611_p2 }
  0x2b   :  { %621 = shalt.err (!%p618_p6)
}
  0x2c   :  { %s654_s12 = smov [#allocation8]  }
  0x2d   :  { %41 = dma.vmem_to_smem %s39_s10, 16, %s654_s12, [#allocation5]  }
  0x2e   :  { %644 = dma.done.wait [#allocation3], 896  }
  0x2f   :  { %645 = vsyncadd [#allocation3], 4294966400 }
  0x30   :  { %646 = dma.done.wait [#allocation7], 448  }
  0x31   :  { %647 = vsyncadd [#allocation7], 4294966848 }
  0x32   :  { %648 = dma.done.wait [#allocation5], 16  }
  0x33   :  { %649 = vsyncadd [#allocation5], 4294967280 }
  0x34   :  { %51 = sfence }
  0x35   :  { %v54_v0 = vld [vmem:[#allocation2 + $0x8] sm:$0xff]  ;;  %v53_v2 = vld [vmem:[#allocation2] sm:$0xff]  ;;  %v67_v7 = vld [vmem:[#allocation6] sm:$0xff]  ;;  %v655_v17 = vmov 0.0   ;;  %vm95_vm0 = vcmask 130048   ;;  %vm656_vm1 = vmmov 0  }
  0x36   :  { %v58_v1 = vld [vmem:[#allocation2 + $0x28] sm:$0xff]  ;;  %v61_v3 = vpack.c.bf16 %v54_v0, %v54_v0  ;;  %v60_v5 = vpack.c.bf16 %v53_v2, %v53_v2  ;;  %v57_v6 = vld [vmem:[#allocation2 + $0x20] sm:$0xff]  ;;  %v465_v10 = vcombine.high %v67_v7, %v67_v7  ;;  %v56_v11 = vld [vmem:[#allocation2 + $0x18] sm:$0xff]  ;;  %v464_v19 = vcombine.low %v67_v7, %v67_v7  ;;  %s262_s1 = sld [smem:[#allocation8]]  ;;  %s472_s2 = sld [smem:[#allocation8 + $0x1]] }
  0x37   :  { %v65_v4 = vpack.c.bf16 %v58_v1, %v58_v1  ;;  %v69_v8 = vld [vmem:[#allocation6 + $0x10] sm:$0xff]  ;;  %v64_v9 = vpack.c.bf16 %v57_v6, %v57_v6  ;;  %v59_v12 = vld [vmem:[#allocation2 + $0x30] sm:$0xff]  ;;  %v63_v14 = vpack.c.bf16 %v56_v11, %v56_v11  ;;  %v68_v18 = vld [vmem:[#allocation6 + $0x8] sm:$0xff]  ;;  %s473_s13 = sld [smem:[#allocation8 + $0x2]]  ;;  %s474_s14 = sld [smem:[#allocation8 + $0x3]]  ;;  %vm445_vm2 = vcmask 57344  }
  0x38   :  { %102 = vmatprep.subr.bf16.mxu1 %v61_v3  ;;  %v469_v13 = vcombine.high %v69_v8, %v69_v8  ;;  %134 = vmatprep.mubr.bf16.mxu1 %v465_v10  ;;  %v55_v15 = vld [vmem:[#allocation2 + $0x10] sm:$0xff]  ;;  %v66_v16 = vpack.c.bf16 %v59_v12, %v59_v12  ;;  %v468_v20 = vcombine.low %v69_v8, %v69_v8  ;;  %s707_s15 = sld [smem:[#allocation8 + $0x4]]  ;;  %s709_s16 = sld [smem:[#allocation8 + $0x8]] }
  0x39   :  { %182 = vmatprep.subr.bf16.mxu0 %v65_v4  ;;  %103 = vmatpush1.bf16.xpose.msra.mxu1 %v60_v5  ;;  %v62_v21 = vpack.c.bf16 %v55_v15, %v55_v15  ;;  %v467_v23 = vcombine.high %v68_v18, %v68_v18  ;;  %v466_v24 = vcombine.low %v68_v18, %v68_v18  ;;  %v529_v25 = vld [vmem:[#allocation6 + $0x18] ss:$0 sps:$4 sm:$0xff]   ;;  %s711_s17 = sld [smem:[#allocation8 + $0xc]]  ;;  %s713_s18 = sld [smem:[#allocation8 + $0x10]] }
  0x3a   :  { %183 = vmatpush1.bf16.xpose.msra.mxu0 %v64_v9  ;;  %214 = vmatprep.mubr.bf16.mxu0 %v469_v13  ;;  %v100_v22 = vsel %vm95_vm0, %v66_v16, 0  ;;  %s715_s19 = sld [smem:[#allocation8 + $0x5]]  ;;  %s717_s20 = sld [smem:[#allocation8 + $0x9]] }
  0x3b   :  { %142 = vmatprep.subr.bf16.mxu1 %v63_v14  ;;  %502 = vmatprep.subr.bf16.mxu0 %v655_v17  ;;  %s719_s21 = sld [smem:[#allocation8 + $0xd]]  ;;  %s721_s22 = sld [smem:[#allocation8 + $0x11]] }
  0x3c   :  { %v263_v28 = vstv %s262_s1  ;;  %v271_v29 = vstv %s472_s2  ;;  %s723_s23 = sld [smem:[#allocation8 + $0x6]]  ;;  %s725_s24 = sld [smem:[#allocation8 + $0xa]] }
  0x3d   :  { %v279_v30 = vstv %s473_s13  ;;  %v287_v31 = vstv %s474_s14  ;;  %s727_s25 = sld [smem:[#allocation8 + $0xe]]  ;;  %s729_s26 = sld [smem:[#allocation8 + $0x12]] }
  0x3e   :  { %s731_s27 = sld [smem:[#allocation8 + $0x7]]  ;;  %s733_s28 = sld [smem:[#allocation8 + $0xb]]  ;;  %v295_v59 = vstv %s707_s15  ;;  %v298_v60 = vstv %s709_s16 }
  0x3f   :  { %s735_s29 = sld [smem:[#allocation8 + $0xf]]  ;;  %s737_s30 = sld [smem:[#allocation8 + $0x13]]  ;;  %v305_v61 = vstv %s711_s17  ;;  %v312_v62 = vstv %s713_s18 }
  0x40   :  { %135 = vmatmul.mubr.bf16.vlgmr.msra.gmra.mrb[0].mxu1 %v464_v19  ;;  %s739_s4 = sld [smem:[#allocation8 + $0x14]]  ;;  %s741_s5 = sld [smem:[#allocation8 + $0x15]]  ;;  %v327_v63 = vstv %s715_s19  ;;  %v330_v0 = vstv %s717_s20 }
  0x41   :  { %215 = vmatmul.mubr.bf16.vlgmr.msra.gmra.mrb[0].mxu0 %v468_v20  ;;  %143 = vmatpush1.bf16.xpose.msra.mxu1 %v62_v21  ;;  %v337_v1 = vstv %s719_s21  ;;  %v344_v2 = vstv %s721_s22  ;;  %s761_s6 = sld [smem:[#allocation8 + $0x16]]  ;;  %s763_s0 = sld [smem:[#allocation8 + $0x17]] }
  0x42   :  { %503 = vmatpush3.bf16.xpose.msra.mxu0 %v100_v22  ;;  %174 = vmatprep.mubr.bf16.mxu1 %v467_v23  ;;  %v359_v3 = vstv %s723_s23  ;;  %v362_v4 = vstv %s725_s24  ;;  %s495_s7 = sld [smem:[#allocation8 + $0x18]]  ;;  %s496_s8 = sld [smem:[#allocation8 + $0x19]] }
  0x43   :  { %504 = vmatprep.mubr.msk.bf16.mxu0 %vm656_vm1, %v655_v17  ;;  %v369_v5 = vstv %s727_s25  ;;  %v376_v6 = vstv %s729_s26  ;;  %s497_s9 = sld [smem:[#allocation8 + $0x1a]]  ;;  %s498_s10 = sld [smem:[#allocation8 + $0x1b]] }
  0x44   :  { %v391_v8 = vstv %s731_s27  ;;  %v394_v9 = vstv %s733_s28  ;;  %s499_s11 = sld [smem:[#allocation8 + $0x1c]]  ;;  %s657_s12 = smov [#allocation9]  }
  0x45   :  { %v401_v10 = vstv %s735_s29  ;;  %v408_v11 = vstv %s737_s30  ;;  %s453_s1 = sshll.u32 %s657_s12, 4  ;;  %s454_s1 = int_to_ptr.vmem [resolvable:$true] %s453_s1 }
  0x46   :  { %v319_v14 = vstv %s739_s4  ;;  %v351_v16 = vstv %s741_s5  ;;  %s622_s2 = scalar_lea.vmem %s454_s1, 16  ;;  %s626_s13 = scalar_lea.vmem %s454_s1, 32 }
  0x47   :  { %p623_p7 = scmp.ne.s32.totalorder %s454_s1, %s622_s2  ;;  %p627_p8 = scmp.lt.s32.totalorder %s454_s1, %s454_s1 }
  0x48   :  { %p628_p9 = scmp.lt.s32.totalorder %s626_s13, %s622_s2 }
  0x4a   :  { %p629_p10 = por %p628_p9, %p627_p8 }
  0x4c   :  { %175 = vmatmul.mubr.bf16.vlgmr.msra.gmra.mrb[0].mxu1 %v466_v24  ;;  %p630_p11 = pnand %p629_p10, %p623_p7 }
  0x4d   :  { %505 = vmatmul.mubr.msk.bf16.vlgmr.msra.gmra.mrb[0].mxu0 %vm95_vm0, %v529_v25 }
 0x11f   :  { %v176_v26 = vpop.f32.mrb[0].mxu1 }
 0x120   :  { %v256_v27 = vpop.f32.mrb[0].mxu0  ;;  %v178_v33 = vpop.f32.mrb[1].mxu1 }
 0x121   :  { %v508_v32 = vadd.f32 %v256_v27, %v176_v26  ;;  %v506_v34 = vpop.f32.mrb[1].mxu0  ;;  %v179_v35 = vpop.f32.mrb[2].mxu1 }
 0x122   :  { %v259_v36 = vpop.f32.mrb[2].mxu0  ;;  %v180_v41 = vpop.f32.mrb[3].mxu1 }
 0x123   :  { %v264_v37 = vadd.f32 %v508_v32, %v263_v28  ;;  %v272_v38 = vadd.f32 %v508_v32, %v271_v29  ;;  %v280_v39 = vadd.f32 %v508_v32, %v279_v30  ;;  %v288_v40 = vadd.f32 %v508_v32, %v287_v31  ;;  %v507_v42 = vpop.f32.mrb[3].mxu0 }
 0x125   :  { %v265_v43 = vsub.f32 0.0, %v264_v37  ;;  %v273_v44 = vsub.f32 0.0, %v272_v38  ;;  %v281_v45 = vsub.f32 0.0, %v280_v39  ;;  %v289_v46 = vsub.f32 0.0, %v288_v40 }
 0x127   :  { %v266_v47 = vmul.f32 1.442695, %v265_v43  ;;  %v274_v48 = vmul.f32 1.442695, %v273_v44  ;;  %v282_v49 = vmul.f32 1.442695, %v281_v45 }
 0x128   :  { %v290_v50 = vmul.f32 1.442695, %v289_v46 }
 0x129   :  { %530 = vpow2.f32 %v266_v47 }
 0x12a   :  { %532 = vpow2.f32 %v274_v48 }
 0x12b   :  { %534 = vpow2.f32 %v282_v49 }
 0x12c   :  { %536 = vpow2.f32 %v290_v50 }
 0x133   :  { %v531_v51 = vpop.eup %530 }
 0x134   :  { %v533_v52 = vpop.eup %532  ;;  %v268_v53 = vadd.f32 1.0, %v531_v51 }
 0x135   :  { %v535_v54 = vpop.eup %534  ;;  %v276_v55 = vadd.f32 1.0, %v533_v52 }
 0x136   :  { %v537_v56 = vpop.eup %536  ;;  %538 = vrcp.f32 %v268_v53  ;;  %v284_v57 = vadd.f32 1.0, %v535_v54  ;;  %v383_v53 = vstv %s761_s6 }
 0x137   :  { %540 = vrcp.f32 %v276_v55  ;;  %v292_v58 = vadd.f32 1.0, %v537_v56 }
 0x138   :  { %542 = vrcp.f32 %v284_v57 }
 0x139   :  { %544 = vrcp.f32 %v292_v58 }
 0x140   :  { %v539_v7 = vpop.eup %538 }
 0x141   :  { %v541_v12 = vpop.eup %540  ;;  %v296_v13 = vmul.f32 %v539_v7, %v295_v59  ;;  %v328_v15 = vmul.f32 %v539_v7, %v327_v63  ;;  %v360_v20 = vmul.f32 %v539_v7, %v359_v3  ;;  %v392_v33 = vmul.f32 %v539_v7, %v391_v8 }
 0x142   :  { %v543_v17 = vpop.eup %542  ;;  %v299_v18 = vmul.f32 %v541_v12, %v298_v60  ;;  %v331_v19 = vmul.f32 %v541_v12, %v330_v0  ;;  %v363_v21 = vmul.f32 %v541_v12, %v362_v4  ;;  %v395_v26 = vmul.f32 %v541_v12, %v394_v9 }
 0x143   :  { %v545_v22 = vpop.eup %544  ;;  %v306_v23 = vmul.f32 %v543_v17, %v305_v61  ;;  %v338_v24 = vmul.f32 %v543_v17, %v337_v1  ;;  %v370_v25 = vmul.f32 %v543_v17, %v369_v5  ;;  %v402_v34 = vmul.f32 %v543_v17, %v401_v10 }
 0x144   :  { %v301_v27 = vrot.slane %v299_v18, 1  ;;  %v313_v28 = vmul.f32 %v545_v22, %v312_v62  ;;  %v333_v29 = vrot.slane %v331_v19, 1  ;;  %v345_v30 = vmul.f32 %v545_v22, %v344_v2 }
 0x145   :  { %v308_v31 = vrot.slane %v306_v23, 2  ;;  %v365_v32 = vrot.slane %v363_v21, 1  ;;  %v340_v37 = vrot.slane %v338_v24, 2  ;;  %v372_v38 = vrot.slane %v370_v25, 2 }
 0x146   :  { %v303_v35 = vadd.f32 %v301_v27, %v296_v13  ;;  %v335_v36 = vadd.f32 %v333_v29, %v328_v15  ;;  %v315_v39 = vrot.slane %v313_v28, 3  ;;  %v377_v41 = vmul.f32 %v545_v22, %v376_v6 }
 0x147   :  { %v367_v40 = vadd.f32 %v365_v32, %v360_v20  ;;  %v397_v42 = vrot.slane %v395_v26, 1  ;;  %v347_v45 = vrot.slane %v345_v30, 3  ;;  %v409_v46 = vmul.f32 %v545_v22, %v408_v11 }
 0x148   :  { %v310_v43 = vadd.f32 %v308_v31, %v303_v35  ;;  %v342_v44 = vadd.f32 %v340_v37, %v335_v36  ;;  %v379_v48 = vrot.slane %v377_v41, 3  ;;  %v404_v50 = vrot.slane %v402_v34, 2 }
 0x149   :  { %v374_v47 = vadd.f32 %v372_v38, %v367_v40  ;;  %v399_v49 = vadd.f32 %v397_v42, %v392_v33  ;;  %v411_v56 = vrot.slane %v409_v46, 3  ;;  %v415_v59 = vstv %s763_s0 }
 0x14a   :  { %v317_v51 = vadd.f32 %v315_v39, %v310_v43  ;;  %v349_v52 = vadd.f32 %v347_v45, %v342_v44  ;;  %v423_v15 = vstv %s495_s7  ;;  %v430_v20 = vstv %s497_s9 }
 0x14b   :  { %v381_v54 = vadd.f32 %v379_v48, %v374_v47  ;;  %v406_v55 = vadd.f32 %v404_v50, %v399_v49  ;;  %v434_v24 = vstv %s498_s10  ;;  %v438_v29 = vstv %s499_s11 }
 0x14c   :  { %v320_v57 = vadd.f32 %v319_v14, %v317_v51  ;;  %v352_v58 = vadd.f32 %v351_v16, %v349_v52  ;;  %v426_v16 = vstv %s496_s8 }
 0x14d   :  { %v384_v60 = vadd.f32 %v383_v53, %v381_v54  ;;  %v413_v61 = vadd.f32 %v411_v56, %v406_v55 }
 0x14e   :  { %v321_v62 = vsub.f32 0.0, %v320_v57  ;;  %v353_v63 = vsub.f32 0.0, %v352_v58 }
 0x14f   :  { %v385_v0 = vsub.f32 0.0, %v384_v60  ;;  %v416_v1 = vadd.f32 %v415_v59, %v413_v61 }
 0x150   :  { %v322_v2 = vmul.f32 1.442695, %v321_v62  ;;  %v354_v3 = vmul.f32 1.442695, %v353_v63 }
 0x151   :  { %v386_v4 = vmul.f32 1.442695, %v385_v0  ;;  %v417_v5 = vsub.f32 0.0, %v416_v1 }
 0x152   :  { %546 = vpow2.f32 %v322_v2 }
 0x153   :  { %548 = vpow2.f32 %v354_v3  ;;  %v418_v6 = vmul.f32 1.442695, %v417_v5 }
 0x154   :  { %550 = vpow2.f32 %v386_v4 }
 0x155   :  { %552 = vpow2.f32 %v418_v6 }
 0x15c   :  { %v547_v7 = vpop.eup %546 }
 0x15d   :  { %v549_v8 = vpop.eup %548  ;;  %v324_v9 = vadd.f32 1.0, %v547_v7 }
 0x15e   :  { %v551_v10 = vpop.eup %550  ;;  %v356_v11 = vadd.f32 1.0, %v549_v8 }
 0x15f   :  { %v553_v12 = vpop.eup %552  ;;  %554 = vrcp.f32 %v324_v9  ;;  %v388_v13 = vadd.f32 1.0, %v551_v10 }
 0x160   :  { %556 = vrcp.f32 %v356_v11  ;;  %v420_v14 = vadd.f32 1.0, %v553_v12 }
 0x161   :  { %558 = vrcp.f32 %v388_v13 }
 0x162   :  { %560 = vrcp.f32 %v420_v14 }
 0x169   :  { %v555_v17 = vpop.eup %554 }
 0x16a   :  { %v557_v18 = vpop.eup %556  ;;  %v424_v19 = vmul.f32 %v555_v17, %v423_v15 }
 0x16b   :  { %v559_v21 = vpop.eup %558  ;;  %v427_v22 = vmul.f32 %v557_v18, %v426_v16 }
 0x16c   :  { %v561_v23 = vpop.eup %560  ;;  %v431_v26 = vmul.f32 %v559_v21, %v430_v20 }
 0x16d   :  { %v428_v25 = vadd.f32 %v427_v22, %v424_v19  ;;  %v435_v28 = vmul.f32 %v561_v23, %v434_v24 }
 0x16f   :  { %v432_v27 = vadd.f32 %v431_v26, %v428_v25 }
 0x171   :  { %v436_v30 = vadd.f32 %v435_v28, %v432_v27 }
 0x173   :  { %v439_v31 = vadd.f32 %v438_v29, %v436_v30 }
 0x175   :  { %v440_v32 = vsub.f32 0.0, %v439_v31 }
 0x177   :  { %v441_v33 = vmul.f32 1.442695, %v440_v32 }
 0x179   :  { %562 = vpow2.f32 %v441_v33 }
 0x183   :  { %v563_v34 = vpop.eup %562 }
 0x184   :  { %v443_v35 = vadd.f32 1.0, %v563_v34 }
 0x186   :  { %564 = vrcp.f32 %v443_v35 }
 0x190   :  { %v565_v36 = vpop.eup %564 }
 0x191   :  { %446 = vst.msk [vmem:[#allocation9] sm:$0x1] %vm445_vm2, %v565_v36 }
 0x192   :  { %633 = shalt.err (!%p630_p11)
}
 0x193   :  { %s634_s16 = scalar_lea.hbm %s782_s3, 16 }
 0x194   :  { %p635_p12 = scmp.ne.s32.totalorder %s782_s3, %s634_s16  ;;  %p638_p13 = scmp.lt.u32.totalorder %s634_s16, %s782_s3 }
 0x196   :  { %p640_p0 = pnand %p638_p13, %p635_p12 }
 0x198   :  { %643 = shalt.err (!%p640_p0)
}
 0x199   :  { %456 = dma.vmem_to_hbm [thread:$0]  %s454_s1, 16, %s782_s3, [#allocation4]  }
 0x19a   :  { %650 = dma.done.wait [#allocation4], 16  }
 0x19b   :  { %651 = vsyncadd [#allocation4], 4294967280 }
 0x19c   :  { %460 = vsyncpa [#allocation3], 1 }
 0x19d   :  { %461 = vsyncpa [#allocation7], 1 }
 0x19e   :  { %462 = vsyncpa [#allocation4], 1 }
 0x19f   :  { %463 = vsyncpa [#allocation5], 1 }

</bundles_post_ra>
